<compile_context>
chip_gen: v6e
topology: v6e:2x2x1
jax: 0.10.0
libtpu: 0.0.40
codegen_flags: <defaults>
</compile_context>

<pallas_src>
import math

import jax
import jax.numpy as jnp
from jax.experimental import pallas as pl
from jax.experimental.pallas import tpu as pltpu

LEAKY_RATE = 0.1


def _make_kernel(c_in, use_vpu):
    """Kernel body for static channel counts. Refs: x (C_in,T), w (C_out,C_in),
    bias (C_out,T), out (C_out,T)."""
    if use_vpu:
        def kernel(x_ref, w_ref, b_ref, o_ref):
            # Tiny channel counts: unrolled VPU FMA chain; hides under the
            # HBM-bound DMA, avoids wasting >97% of a padded MXU contraction.
            x = x_ref[...].astype(jnp.float32)          # (C_in, T)
            w = w_ref[...].astype(jnp.float32)          # (C_out, C_in)
            y = b_ref[...].astype(jnp.float32)          # (C_out, T) — start at bias
            for c in range(c_in):                       # static unroll (c_in small)
                y = y + w[:, c:c + 1] * x[c:c + 1, :]
            o_ref[...] = jnp.where(y > 0, y, LEAKY_RATE * y).astype(o_ref.dtype)
    else:
        def kernel(x_ref, w_ref, b_ref, o_ref):
            # Pointwise conv == channel matmul on the MXU.
            y = jnp.dot(w_ref[...], x_ref[...], preferred_element_type=jnp.float32)
            y = y + b_ref[...].astype(jnp.float32)
            o_ref[...] = jnp.where(y > 0, y, LEAKY_RATE * y).astype(o_ref.dtype)
    return kernel


def _budgets():
    """(pipelined-tile traffic budget, scoped VMEM limit) by TPU generation."""
    try:
        cap = int(pltpu.get_tpu_info().vmem_capacity_bytes)
    except Exception:
        cap = 0
    if cap >= 100 * 1024 * 1024:
        # v5e / v6e: 128 MiB physical VMEM — larger tiles, fewer grid steps.
        return 32 * 1024 * 1024, 80 * 1024 * 1024
    # v7x (64 MiB physical) or unknown: stay conservative.
    return 16 * 1024 * 1024, 32 * 1024 * 1024


def _pick_tile_l(L, N, per_col_bytes, traffic_budget):
    """Largest multiple of 128 that divides L and fits the traffic budget, then
    shrink until the grid has >= 4 total steps (pipelining + 2 v7x cores)."""
    q = L // 128
    divs, i = set(), 1
    while i * i <= q:
        if q % i == 0:
            divs.add(i)
            divs.add(q // i)
        i += 1
    cands = sorted((128 * d for d in divs), reverse=True)      # descending
    tile_l = next((c for c in cands if c * per_col_bytes <= traffic_budget),
                  cands[-1])
    while N * (L // tile_l) < 4:
        smaller = [c for c in cands if c < tile_l]
        if not smaller:
            break
        tile_l = smaller[0]
    return tile_l


def bias_conv1d(x, weight, bias):
    """x: (N, C_in, L), weight: (C_out, C_in), bias: (C_out, L) -> (N, C_out, L)."""
    N, C_in, L = x.shape
    C_out = weight.shape[0]
    assert weight.shape == (C_out, C_in)
    assert bias.shape == (C_out, L)

    dtype = x.dtype
    itemsize = jnp.dtype(dtype).itemsize
    b_itemsize = jnp.dtype(bias.dtype).itemsize
    w_bytes = weight.size * jnp.dtype(weight.dtype).itemsize

    traffic_budget, vmem_limit = _budgets()
    per_col = 2 * (C_in + C_out) * itemsize       # double-buffered x + out, per column
    use_vpu = (C_in <= 8 and C_out <= 16)
    kernel = _make_kernel(C_in, use_vpu)
    flops = 2 * N * C_out * C_in * L

    # ------------------- Path A: native NCL layout (L % 128 == 0) -------------------
    if L % 128 == 0:
        tile_l = _pick_tile_l(L, N, per_col, traffic_budget)
        num_t = L // tile_l
        cost = pl.CostEstimate(
            flops=flops, transcendentals=0,
            bytes_accessed=int(x.size * itemsize + w_bytes
                               + bias.size * b_itemsize       # fetched once per l-tile
                               + N * C_out * L * itemsize))
        return pl.pallas_call(
            kernel,
            out_shape=jax.ShapeDtypeStruct((N, C_out, L), dtype),
            grid_spec=pltpu.PrefetchScalarGridSpec(
                num_scalar_prefetch=0,
                # Batch is the INNER axis so the bias block index only changes on
                # the outer l-tile axis -> bias DMA'd once per l-tile, not per step.
                grid=(num_t, N),
                in_specs=[
                    pl.BlockSpec((None, C_in, tile_l), lambda t, n: (n, 0, t)),  # x
                    pl.BlockSpec((C_out, C_in), lambda t, n: (0, 0)),            # W (resident)
                    pl.BlockSpec((C_out, tile_l), lambda t, n: (0, t)),          # bias
                ],
                out_specs=pl.BlockSpec((None, C_out, tile_l), lambda t, n: (n, 0, t)),
            ),
            compiler_params=pltpu.CompilerParams(
                dimension_semantics=("parallel", "parallel"),
                vmem_limit_bytes=vmem_limit),
            cost_estimate=cost,
        )(x, weight, bias)

    # ------------------- Collapsed-batch paths (small / irregular L) ----------------
    P = N * L
    x2 = jnp.transpose(x, (1, 0, 2)).reshape(C_in, P)        # (C_in, N*L), lane-dense

    granule = (128 * L) // math.gcd(128, L)                  # lcm(128, L)
    if P <= granule or granule * per_col <= traffic_budget:
        # --- Path B: bias resident in VMEM, pre-tiled only to tile_p columns ---
        if P <= granule:
            tile_p = P                                        # one full-extent block
        else:
            tile_p = max(granule,
                         (traffic_budget // per_col) // granule * granule)
            if P >= 4 * granule:                              # keep >= 4 grid steps
                tile_p = min(tile_p, max(granule, (P // 4) // granule * granule))
            if tile_p >= P:
                tile_p = P
        grid_p = pl.cdiv(P, tile_p)
        # tile_p is a multiple of L (granule = lcm(128, L); P = N*L), so every block
        # starts on a bias-period boundary and this small tile is exact everywhere.
        bias_operand = jnp.tile(bias, (1, tile_p // L))       # (C_out, tile_p), tiny
        in_specs = [
            pl.BlockSpec((C_in, tile_p), lambda t: (0, t)),   # x tile
            pl.BlockSpec((C_out, C_in), lambda t: (0, 0)),    # W (resident)
            pl.BlockSpec((C_out, tile_p), lambda t: (0, 0)),  # bias (resident, 1 DMA)
        ]
        bias_bytes = bias_operand.size * b_itemsize
    else:
        # --- Path C (rare: L % 128 != 0 and lcm(128, L) exceeds the tile budget) ---
        # TODO(synk): this fallback re-materialises the bias over the batch in HBM.
        tile_p = max(128, (traffic_budget // per_col) // 128 * 128)
        if P >= 4 * 128:
            tile_p = min(tile_p, max(128, (P // 4) // 128 * 128))
        if tile_p >= P:
            tile_p = P
        grid_p = pl.cdiv(P, tile_p)
        bias_operand = jnp.tile(bias, (1, N))                 # (C_out, P)
        in_specs = [
            pl.BlockSpec((C_in, tile_p), lambda t: (0, t)),
            pl.BlockSpec((C_out, C_in), lambda t: (0, 0)),
            pl.BlockSpec((C_out, tile_p), lambda t: (0, t)),
        ]
        bias_bytes = bias_operand.size * b_itemsize

    cost = pl.CostEstimate(
        flops=flops, transcendentals=0,
        bytes_accessed=int(x.size * itemsize + w_bytes + bias_bytes
                           + C_out * P * itemsize))
    out2 = pl.pallas_call(
        kernel,
        out_shape=jax.ShapeDtypeStruct((C_out, P), dtype),
        grid_spec=pltpu.PrefetchScalarGridSpec(
            num_scalar_prefetch=0,
            grid=(grid_p,),
            in_specs=in_specs,
            out_specs=pl.BlockSpec((C_out, tile_p), lambda t: (0, t)),
        ),
        compiler_params=pltpu.CompilerParams(
            dimension_semantics=("parallel",),
            vmem_limit_bytes=vmem_limit),
        cost_estimate=cost,
    )(x2, weight, bias_operand)

    # Back to the PyTorch NCL layout (only for the small-/irregular-L paths).
    return jnp.transpose(out2.reshape(C_out, N, L), (1, 0, 2))


def reference(x, weight, bias):
    y = jnp.einsum("oc,ncl->nol", weight, x,
                   precision=jax.lax.Precision.HIGHEST) + bias[None]
    return jnp.where(y > 0, y, LEAKY_RATE * y)


def _check(out, ref, atol, rtol, name):
    assert out.shape == ref.shape, f"{name}: shape mismatch {out.shape} vs {ref.shape}"
    assert jnp.allclose(out, ref, atol=atol, rtol=rtol), f"{name}: mismatch vs reference"


if __name__ == "__main__":
    key = jax.random.PRNGKey(0)

    # --- Test 1: small shapes consistent with the module (collapsed path,
    #             VPU kernel, single full-extent block) ------------------------
    N, C_in, C_out, L = 2, 4, 8, 16
    k1, k2, k3, key = jax.random.split(key, 4)
    x = jax.random.normal(k1, (N, C_in, L), dtype=jnp.float32)
    # Conv1d weight (out, in, k=1) squeezed to (out, in); deterministic init.
    weight = jax.random.normal(k2, (C_out, C_in), dtype=jnp.float32) * 0.1
    # nn.Parameter(torch.randn(out_channels, bias_length))
    bias = jax.random.normal(k3, (C_out, L), dtype=jnp.float32)

    out = jax.block_until_ready(bias_conv1d(x, weight, bias))
    _check(out, reference(x, weight, bias), 1e-5, 1e-5, "small")

    # --- Test 2: larger channels/length (native-NCL path, MXU kernel,
    #             no wrapper relayouts, bias fetched once per l-tile) ----------
    N2, C_in2, C_out2, L2 = 2, 64, 64, 1024
    k1, k2, k3, key = jax.random.split(key, 4)
    x2 = jax.random.normal(k1, (N2, C_in2, L2), dtype=jnp.float32)
    w2 = jax.random.normal(k2, (C_out2, C_in2), dtype=jnp.float32) * 0.1
    b2 = jax.random.normal(k3, (C_out2, L2), dtype=jnp.float32)

    out2 = jax.block_until_ready(bias_conv1d(x2, w2, b2))
    _check(out2, reference(x2, w2, b2), 1e-4, 1e-4, "native")

    # --- Test 3: small L, larger batch (collapsed path with a multi-step grid,
    #             resident pre-tiled bias, VPU kernel) --------------------------
    N3, C_in3, C_out3, L3 = 64, 4, 8, 16
    k1, k2, k3, key = jax.random.split(key, 4)
    x3 = jax.random.normal(k1, (N3, C_in3, L3), dtype=jnp.float32)
    w3 = jax.random.normal(k2, (C_out3, C_in3), dtype=jnp.float32) * 0.1
    b3 = jax.random.normal(k3, (C_out3, L3), dtype=jnp.float32)

    out3 = jax.block_until_ready(bias_conv1d(x3, w3, b3))
    _check(out3, reference(x3, w3, b3), 1e-5, 1e-5, "collapsed-tiled")

    print("KERNEL_OK")
</pallas_src>

<mosaic_0001>
module attributes {stable_mosaic.version = 11 : i64} {
  func.func @kernel(%arg0: i32, %arg1: memref<4x32xf32, #tpu.memory_space<vmem>>, %arg2: memref<8x4xf32, #tpu.memory_space<vmem>>, %arg3: memref<8x32xf32, #tpu.memory_space<vmem>>, %arg4: memref<8x32xf32, #tpu.memory_space<vmem>>) attributes {dimension_semantics = [#tpu.dimension_semantics<parallel>], iteration_bounds = array<i64: 1>, scalar_prefetch = 0 : i64, scratch_operands = 0 : i64, tpu.core_type = #tpu.core_type<tc>, window_params = [{transform_indices = @transform_0, window_bounds = array<i64: 4, 32>}, {pipeline_mode = #tpu.pipeline_mode<synchronous>, transform_indices = @transform_1, window_bounds = array<i64: 8, 4>}, {pipeline_mode = #tpu.pipeline_mode<synchronous>, transform_indices = @transform_2, window_bounds = array<i64: 8, 32>}, {transform_indices = @transform_3, window_bounds = array<i64: 8, 32>}]} {
    %c0 = arith.constant 0 : index
    %c0_0 = arith.constant 0 : index
    %0 = vector.load %arg1[%c0, %c0_0] : memref<4x32xf32, #tpu.memory_space<vmem>>, vector<4x32xf32>
    %c0_1 = arith.constant 0 : index
    %c0_2 = arith.constant 0 : index
    %1 = vector.load %arg2[%c0_1, %c0_2] : memref<8x4xf32, #tpu.memory_space<vmem>>, vector<8x4xf32>
    %c0_3 = arith.constant 0 : index
    %c0_4 = arith.constant 0 : index
    %2 = vector.load %arg3[%c0_3, %c0_4] : memref<8x32xf32, #tpu.memory_space<vmem>>, vector<8x32xf32>
    %3 = vector.extract_strided_slice %1 {offsets = [0, 0], sizes = [8, 1], strides = [1, 1]} : vector<8x4xf32> to vector<8x1xf32>
    %4 = vector.extract_strided_slice %0 {offsets = [0, 0], sizes = [1, 32], strides = [1, 1]} : vector<4x32xf32> to vector<1x32xf32>
    %5 = vector.broadcast %3 : vector<8x1xf32> to vector<8x32xf32>
    %6 = vector.broadcast %4 : vector<1x32xf32> to vector<8x32xf32>
    %7 = arith.mulf %5, %6 : vector<8x32xf32>
    %8 = arith.addf %2, %7 : vector<8x32xf32>
    %9 = vector.extract_strided_slice %1 {offsets = [0, 1], sizes = [8, 1], strides = [1, 1]} : vector<8x4xf32> to vector<8x1xf32>
    %10 = vector.extract_strided_slice %0 {offsets = [1, 0], sizes = [1, 32], strides = [1, 1]} : vector<4x32xf32> to vector<1x32xf32>
    %11 = vector.broadcast %9 : vector<8x1xf32> to vector<8x32xf32>
    %12 = vector.broadcast %10 : vector<1x32xf32> to vector<8x32xf32>
    %13 = arith.mulf %11, %12 : vector<8x32xf32>
    %14 = arith.addf %8, %13 : vector<8x32xf32>
    %15 = vector.extract_strided_slice %1 {offsets = [0, 2], sizes = [8, 1], strides = [1, 1]} : vector<8x4xf32> to vector<8x1xf32>
    %16 = vector.extract_strided_slice %0 {offsets = [2, 0], sizes = [1, 32], strides = [1, 1]} : vector<4x32xf32> to vector<1x32xf32>
    %17 = vector.broadcast %15 : vector<8x1xf32> to vector<8x32xf32>
    %18 = vector.broadcast %16 : vector<1x32xf32> to vector<8x32xf32>
    %19 = arith.mulf %17, %18 : vector<8x32xf32>
    %20 = arith.addf %14, %19 : vector<8x32xf32>
    %21 = vector.extract_strided_slice %1 {offsets = [0, 3], sizes = [8, 1], strides = [1, 1]} : vector<8x4xf32> to vector<8x1xf32>
    %22 = vector.extract_strided_slice %0 {offsets = [3, 0], sizes = [1, 32], strides = [1, 1]} : vector<4x32xf32> to vector<1x32xf32>
    %23 = vector.broadcast %21 : vector<8x1xf32> to vector<8x32xf32>
    %24 = vector.broadcast %22 : vector<1x32xf32> to vector<8x32xf32>
    %25 = arith.mulf %23, %24 : vector<8x32xf32>
    %26 = arith.addf %20, %25 : vector<8x32xf32>
    %cst = arith.constant 0.000000e+00 : f32
    %27 = vector.broadcast %cst : f32 to vector<8x32xf32>
    %28 = arith.cmpf ogt, %26, %27 : vector<8x32xf32>
    %cst_5 = arith.constant 1.000000e-01 : f32
    %29 = vector.broadcast %cst_5 : f32 to vector<8x32xf32>
    %30 = arith.mulf %29, %26 : vector<8x32xf32>
    %31 = arith.select %28, %26, %30 : vector<8x32xi1>, vector<8x32xf32>
    %c0_6 = arith.constant 0 : index
    %c0_7 = arith.constant 0 : index
    %32 = vector.load %arg4[%c0_6, %c0_7] : memref<8x32xf32, #tpu.memory_space<vmem>>, vector<8x32xf32>
    tpu.vector_store %arg4[%c0_6, %c0_7], %31 {strides = array<i32>} : memref<8x32xf32, #tpu.memory_space<vmem>>, vector<8x32xf32>,
    return
  }
  func.func @transform_0(%arg0: i32) -> (i32, i32) {
    %c0_i32 = arith.constant 0 : i32
    %c0_i32_0 = arith.constant 0 : i32
    return %c0_i32, %arg0 : i32, i32
  }
  func.func @transform_1(%arg0: i32) -> (i32, i32) {
    %c0_i32 = arith.constant 0 : i32
    %c0_i32_0 = arith.constant 0 : i32
    %c0_i32_1 = arith.constant 0 : i32
    return %c0_i32, %c0_i32_0 : i32, i32
  }
  func.func @transform_2(%arg0: i32) -> (i32, i32) {
    %c0_i32 = arith.constant 0 : i32
    %c0_i32_0 = arith.constant 0 : i32
    %c0_i32_1 = arith.constant 0 : i32
    return %c0_i32, %c0_i32_0 : i32, i32
  }
  func.func @transform_3(%arg0: i32) -> (i32, i32) {
    %c0_i32 = arith.constant 0 : i32
    %c0_i32_0 = arith.constant 0 : i32
    return %c0_i32, %arg0 : i32, i32
  }
}

</mosaic_0001>

<bundles_post_ra>
// kernel: tpu_custom_call.1
= control target key start
LH: loop header
LB: loop body
LE: loop exit
PB: predicated region body
PF: predicated region fallthrough
CT: control target
= control target key end

     0   :  { %v110_v1 = vmov 0   ;;  %v111_v2 = vmov 2   ;;  %s147_s0 = inlined_call_operand.vmem [shape: f32[4,32], index: 0, kind: input, shape index: {}]   ;;  %s148_s1 = inlined_call_operand.vmem [shape: f32[8,4], index: 1, kind: input, shape index: {}]   ;;  %s149_s2 = inlined_call_operand.vmem [shape: f32[8,32], index: 2, kind: input, shape index: {}]   ;;  %s150_s3 = inlined_call_operand.hbm [shape: f32[8,32], index: 3, kind: output, shape index: {}]  }
   0x1   :  { %v16_v0 = vld [vmem:[%s148_s1] sm:$0xff]  ;;  %83 = vset.pattern.permute.xlu0 %v110_v1  ;;  %85 = vset.pattern.permute.xlu1 %v111_v2 }
   0x2   :  { %8 = vsyncpa [#allocation3], 0  ;;  %20 = vperm.xlu0 %83, %v16_v0   ;;  %40 = vperm.xlu1 %85, %v16_v0   ;;  %v112_v3 = vmov 1   ;;  %v113_v4 = vmov 3   ;;  %v23_v5 = vlaneseq  ;;  %v15_v8 = vld [vmem:[%s147_s0] sm:$0xf] }
   0x3   :  { %v17_v17 = vld [vmem:[%s149_s2] sm:$0xff]  ;;  %s114_s0 = smov [#allocation2]   ;;  %vm62_vm1 = vcmask 261120  }
   0x4   :  { %v24_v6 = vshrl.u32 %v23_v5, 7  ;;  %s70_s17 = sshll.u32 %s114_s0, 4  ;;  %s71_s17 = int_to_ptr.vmem [resolvable:$true] %s70_s17 }
   0x5   :  { %s88_s2 = scalar_lea.vmem %s71_s17, 128  ;;  %p93_p1 = scmp.lt.s32.totalorder %s71_s17, %s71_s17 }
   0x6   :  { %84 = vset.pattern.permute.xlu0 %v112_v3  ;;  %86 = vset.pattern.permute.xlu1 %v113_v4  ;;  %v25_v7 = vsub.s32 0, %v24_v6  ;;  %v35_v10 = vsub.s32 1, %v24_v6  ;;  %v45_v12 = vsub.s32 2, %v24_v6  ;;  %v55_v14 = vsub.s32 3, %v24_v6  ;;  %p89_p0 = scmp.ne.s32.totalorder %s71_s17, %s88_s2  ;;  %p94_p2 = scmp.lt.s32.totalorder %s88_s2, %s88_s2 }
   0x7   :  { %30 = vperm.xlu0 %84, %v16_v0   ;;  %50 = vperm.xlu1 %86, %v16_v0  }
   0x8   :  { %v26_v9 = vrot.slane %v15_v8, %v25_v7  ;;  %v36_v16 = vrot.slane %v15_v8, %v35_v10  ;;  %v46_v18 = vrot.slane %v15_v8, %v45_v12  ;;  %v56_v19 = vrot.slane %v15_v8, %v55_v14  ;;  %p95_p3 = por %p94_p2, %p93_p1 }
   0xa   :  { %p96_p4 = pnand %p95_p3, %p89_p0 }
   0xb   :  { %87 = vset.pattern.permute.xlu0 %v113_v4 }
  0x7d   :  { %v21_v11 = vpop.permute.xlu0 %20  ;;  %v41_v13 = vpop.permute.xlu1 %40 }
  0x7e   :  { %v27_v15 = vmul.f32 %v26_v9, %v21_v11  ;;  %v47_v24 = vmul.f32 %v46_v18, %v41_v13 }
  0x80   :  { %v28_v22 = vadd.f32 %v27_v15, %v17_v17 }
  0x82   :  { %v31_v20 = vpop.permute.xlu0 %30  ;;  %v51_v21 = vpop.permute.xlu1 %50 }
  0x83   :  { %v37_v23 = vmul.f32 %v36_v16, %v31_v20  ;;  %v57_v26 = vmul.f32 %v56_v19, %v51_v21 }
  0x85   :  { %v38_v25 = vadd.f32 %v37_v23, %v28_v22 }
  0x87   :  { %v48_v27 = vadd.f32 %v47_v24, %v38_v25 }
  0x89   :  { %v58_v28 = vadd.f32 %v57_v26, %v48_v27 }
  0x8b   :  { %v60_v29 = vmul.f32 0.1, %v58_v28  ;;  %vm59_vm0 = vcmp.gt.f32.partialorder %v58_v28, 0.0 }
  0x8d   :  { %v61_v30 = vsel %vm59_vm0, %v58_v28, %v60_v29 }
  0x8e   :  { %63 = vst.msk [vmem:[#allocation2] sm:$0xff] %vm62_vm1, %v61_v30 }
  0x8f   :  { %99 = shalt.err (!%p96_p4)
}
  0x90   :  { %73 = dma.vmem_to_hbm [thread:$0]  %s71_s17, 128, %s150_s3, [#allocation3]  }
  0x91   :  { %108 = dma.done.wait [#allocation3], 128  }
  0x92   :  { %109 = vsyncadd [#allocation3], 4294967168 }
  0x93   :  { %77 = vsyncpa [#allocation3], 1 }

</bundles_post_ra>
